<compile_context>
chip_gen: v5e
topology: v5e:2x2
jax: 0.10.0
libtpu: 0.0.40
codegen_flags: <defaults>
</compile_context>

<pallas_src>
import math

import jax
import jax.numpy as jnp
from jax.experimental import pallas as pl
from jax.experimental.pallas import tpu as pltpu


# ----------------------------------------------------------------------------
# Kernels
# ----------------------------------------------------------------------------
def _add_pe_kernel(x_ref, pe_ref, o_ref):
    """out = x + pe  (blocks are (1, TS, D), same dtype)."""
    o_ref[...] = x_ref[...] + pe_ref[...]


def _add_pe_dropout_kernel(x_ref, pe_ref, m_ref, o_ref):
    """out = (x + pe) * mask, mask pre-scaled by 1/(1-p) (inverted dropout)."""
    o_ref[...] = (x_ref[...] + pe_ref[...]) * m_ref[...]


# ----------------------------------------------------------------------------
# Helpers
# ----------------------------------------------------------------------------
def _make_pe(max_seq_len, d_model, dtype=jnp.float32):
    """Identical to the PyTorch buffer construction. Shape (1, L, D)."""
    position = jnp.arange(max_seq_len, dtype=jnp.float32)[:, None]
    div_term = jnp.exp(
        jnp.arange(0, d_model, 2, dtype=jnp.float32) * (-math.log(10000.0) / d_model)
    )
    pe = jnp.zeros((max_seq_len, d_model), dtype=jnp.float32)
    pe = pe.at[:, 0::2].set(jnp.sin(position * div_term))
    pe = pe.at[:, 1::2].set(jnp.cos(position * div_term))
    return pe[None].astype(dtype)


def _choose_seq_tile(S, D, itemsize, max_tile_bytes=2 * 1024 * 1024, max_rows=1024):
    """Largest multiple-of-8 divisor of S within the row/byte budget.

    Falls back to the full sequence (block == full dim is always legal).
    """
    budget_rows = max(8, max_tile_bytes // max(1, D * itemsize))
    cap = min(max_rows, budget_rows, S)
    for cand in range(cap, 7, -1):
        if cand % 8 == 0 and S % cand == 0:
            return cand
    return S


# ----------------------------------------------------------------------------
# Module wrapper
# ----------------------------------------------------------------------------
class PositionalEncodingPallas:
    """Pallas equivalent of the PyTorch PositionalEncoding module."""

    def __init__(self, d_model, max_seq_len, dropout=0.1):
        self.d_model = d_model
        self.max_seq_len = max_seq_len
        self.dropout = float(dropout)
        # Precomputed once, like register_buffer('pe', ...) in PyTorch.
        self._pe = _make_pe(max_seq_len, d_model)  # (1, L, D) float32

    def __call__(self, x, *, training=False, rng=None):
        B, S, D = x.shape
        assert D == self.d_model
        assert S <= self.max_seq_len

        pe = self._pe[:, :S, :].astype(x.dtype)  # (1, S, D)

        ts = _choose_seq_tile(S, D, jnp.dtype(x.dtype).itemsize)
        n_s = S // ts

        # Grid: sequence tiles outer, batch inner.  The PE block index is
        # constant over the inner (batch) axis, so Pallas keeps it resident
        # in VMEM and only re-DMAs it when the sequence tile changes.
        grid = (n_s, B)
        x_spec = pl.BlockSpec((1, ts, D), lambda s, b: (b, s, 0))
        pe_spec = pl.BlockSpec((1, ts, D), lambda s, b: (0, s, 0))
        out_spec = pl.BlockSpec((1, ts, D), lambda s, b: (b, s, 0))

        compiler_params = pltpu.CompilerParams(
            dimension_semantics=("parallel", "parallel"),
            vmem_limit_bytes=32 * 1024 * 1024,
        )
        out_shape = jax.ShapeDtypeStruct((B, S, D), x.dtype)

        if training and self.dropout > 0.0:
            if rng is None:
                rng = jax.random.PRNGKey(0)
            keep = jax.random.bernoulli(rng, 1.0 - self.dropout, (B, S, D))
            scale = jnp.asarray(1.0 / (1.0 - self.dropout), dtype=x.dtype)
            mask = keep.astype(x.dtype) * scale  # 0 or 1/(1-p)
            return pl.pallas_call(
                _add_pe_dropout_kernel,
                out_shape=out_shape,
                grid=grid,
                in_specs=[x_spec, pe_spec, x_spec],
                out_specs=out_spec,
                compiler_params=compiler_params,
            )(x, pe, mask)

        return pl.pallas_call(
            _add_pe_kernel,
            out_shape=out_shape,
            grid=grid,
            in_specs=[x_spec, pe_spec],
            out_specs=out_spec,
            compiler_params=compiler_params,
        )(x, pe)


# ----------------------------------------------------------------------------
# Demo / self-check
# ----------------------------------------------------------------------------
if __name__ == "__main__":
    key = jax.random.PRNGKey(0)
    k_x1, k_x2, k_drop = jax.random.split(key, 3)

    # Primary shape: lane-dense d_model (multiple of 128) for unmasked stores.
    B, S, D = 2, 64, 128
    max_seq_len = 128
    x = jax.random.normal(k_x1, (B, S, D), dtype=jnp.float32)
    module = PositionalEncodingPallas(d_model=D, max_seq_len=max_seq_len, dropout=0.1)

    # Eval mode: dropout is identity -> must match reference exactly.
    out = jax.block_until_ready(module(x, training=False))
    ref = x + _make_pe(max_seq_len, D)[:, :S, :]
    assert jnp.allclose(out, ref, atol=1e-5, rtol=1e-5), "eval mismatch vs reference"

    # Training mode: inverted dropout. Every output element is either 0 or
    # (x + pe) * 1/(1-p).
    out_train = jax.block_until_ready(module(x, training=True, rng=k_drop))
    assert out_train.shape == x.shape
    scaled = ref * jnp.float32(1.0 / (1.0 - module.dropout))
    ok = jnp.isclose(out_train, 0.0) | jnp.isclose(out_train, scaled, atol=1e-5, rtol=1e-5)
    assert bool(jnp.all(ok)), "training-mode output not consistent with dropout(x+pe)"

    # Secondary tiny-shape check (d_model < 128 still works correctly).
    B2, S2, D2 = 2, 8, 32
    x2 = jax.random.normal(k_x2, (B2, S2, D2), dtype=jnp.float32)
    module2 = PositionalEncodingPallas(d_model=D2, max_seq_len=16, dropout=0.1)
    out2 = jax.block_until_ready(module2(x2, training=False))
    ref2 = x2 + _make_pe(16, D2)[:, :S2, :]
    assert jnp.allclose(out2, ref2, atol=1e-5, rtol=1e-5), "small-shape mismatch"

    print("KERNEL_OK")
</pallas_src>

<mosaic_0001>
module attributes {stable_mosaic.version = 11 : i64} {
  func.func @_add_pe_kernel(%arg0: i32, %arg1: i32, %arg2: memref<1x64x128xf32, #tpu.memory_space<vmem>>, %arg3: memref<1x64x128xf32, #tpu.memory_space<vmem>>, %arg4: memref<1x64x128xf32, #tpu.memory_space<vmem>>) attributes {dimension_semantics = [#tpu.dimension_semantics<parallel>, #tpu.dimension_semantics<parallel>], iteration_bounds = array<i64: 1, 2>, scalar_prefetch = 0 : i64, scratch_operands = 0 : i64, tpu.core_type = #tpu.core_type<tc>, window_params = [{transform_indices = @transform_0, window_bounds = array<i64: 1, 64, 128>}, {transform_indices = @transform_1, window_bounds = array<i64: 1, 64, 128>}, {transform_indices = @transform_2, window_bounds = array<i64: 1, 64, 128>}]} {
    %c0 = arith.constant 0 : index
    %c0_0 = arith.constant 0 : index
    %c0_1 = arith.constant 0 : index
    %0 = vector.load %arg2[%c0, %c0_0, %c0_1] : memref<1x64x128xf32, #tpu.memory_space<vmem>>, vector<1x64x128xf32>
    %c0_2 = arith.constant 0 : index
    %c0_3 = arith.constant 0 : index
    %c0_4 = arith.constant 0 : index
    %1 = vector.load %arg3[%c0_2, %c0_3, %c0_4] : memref<1x64x128xf32, #tpu.memory_space<vmem>>, vector<1x64x128xf32>
    %2 = arith.addf %0, %1 : vector<1x64x128xf32>
    %c0_5 = arith.constant 0 : index
    %c0_6 = arith.constant 0 : index
    %c0_7 = arith.constant 0 : index
    %3 = vector.load %arg4[%c0_5, %c0_6, %c0_7] : memref<1x64x128xf32, #tpu.memory_space<vmem>>, vector<1x64x128xf32>
    tpu.vector_store %arg4[%c0_5, %c0_6, %c0_7], %2 {strides = array<i32>} : memref<1x64x128xf32, #tpu.memory_space<vmem>>, vector<1x64x128xf32>,
    return
  }
  func.func @transform_0(%arg0: i32, %arg1: i32) -> (i32, i32, i32) {
    %c0_i32 = arith.constant 0 : i32
    %c0_i32_0 = arith.constant 0 : i32
    return %arg1, %arg0, %c0_i32 : i32, i32, i32
  }
  func.func @transform_1(%arg0: i32, %arg1: i32) -> (i32, i32, i32) {
    %c0_i32 = arith.constant 0 : i32
    %c0_i32_0 = arith.constant 0 : i32
    %c0_i32_1 = arith.constant 0 : i32
    return %c0_i32, %arg0, %c0_i32_0 : i32, i32, i32
  }
  func.func @transform_2(%arg0: i32, %arg1: i32) -> (i32, i32, i32) {
    %c0_i32 = arith.constant 0 : i32
    %c0_i32_0 = arith.constant 0 : i32
    return %arg1, %arg0, %c0_i32 : i32, i32, i32
  }
}

</mosaic_0001>

<bundles_post_ra>
// kernel: tpu_custom_call.1
= control target key start
LH: loop header
LB: loop body
LE: loop exit
PB: predicated region body
PF: predicated region fallthrough
CT: control target
= control target key end

     0   :  { %7 = vsyncpa [#allocation3], 0  ;;  %s788_s0 = inlined_call_operand.hbm [shape: f32[2,64,128], index: 0, kind: input, shape index: {}]   ;;  %s789_s1 = inlined_call_operand.hbm [shape: f32[1,64,128], index: 1, kind: input, shape index: {}]   ;;  %s790_s2 = inlined_call_operand.hbm [shape: f32[2,64,128], index: 2, kind: output, shape index: {}]  }
   0x1   :  { %9 = vsyncpa [#allocation3 + $0x1], 0 }
   0x2   :  { %10 = vsyncpa [#allocation6], 0 }
   0x3   :  { %11 = vsyncpa [#allocation4], 0 }
   0x4   :  { %13 = vsyncpa [#allocation4 + $0x1], 0  ;;  %s623_s9 = smov 0   ;;  %s625_s10 = smov 0  }
   0x5   :  { %s627_s11 = smov 0   ;;  %s629_s12 = smov 0  }
   0x6   :  { %s631_s13 = smov 0   ;;  %s633_s14 = smov 0  }
   0x7 LB: > { %s359_s15 = sadd.s32 4294967295, %s601_s14   ;;  %s360_s16 = sadd.s32 4294967294, %s601_s14   ;;  %s601_s14 = sphi %s633_s14, %s19_s14   ;;  %s597_s13 = sphi %s631_s13, %s802_s13   ;;  %s593_s12 = sphi %s629_s12, %s801_s12   ;;  %s589_s11 = sphi %s627_s11, %s800_s11   ;;  %s585_s10 = sphi %s625_s10, %s799_s10   ;;  %s581_s9 = sphi %s623_s9, %s798_s9  }
   0x8   : > { %p53_p0 = scmp.ne.s32.totalorder %s585_s10, %s581_s9  ;;  %p657_p1 = scmp.eq.s32.totalorder %s359_s15, 0 }
   0x9   : > { %p661_p2 = scmp.eq.s32.totalorder %s359_s15, 1  ;;  %p111_p3 = scmp.eq.s32.totalorder %s360_s16, 1 }
   0xa   : > { %p667_p4 = por %p657_p1, %p53_p0  ;;  %p361_p5 = scmp.ge.s32.totalorder %s601_s14, 1 }
   0xb   : > { %p672_p6 = por %p111_p3, %p53_p0  ;;  %p118_p7 = scmp.lt.s32.totalorder %s601_s14, 3 }
   0xc   : > { %s132_s23 = sshll.u32 %s789_s1, 4  ;;  %s603_s25 = smov [#allocation5]   ;;  %s133_s23 = int_to_ptr.hbm [resolvable:$true] %s132_s23 }
   0xd   : > { %p680_p8 = pnand %p361_p5, %p118_p7  ;;  %s134_s26 = sshll.u32 %s603_s25, 4  ;;  %s135_s26 = int_to_ptr.vmem [resolvable:$true] %s134_s26 }
   0xe   : > { %p363_p11 = scmp.ge.s32.totalorder %s601_s14, 2  ;;  %s604_s27 = smov 128  }
   0xf   : > { %p386_p9 = pneg %p680_p8  ;;  %s605_s28 = smov 8  }
  0x10   : > { %s28_s29 = sadd.s32 1, %s597_s13  ;;  %s40_s30 = sadd.s32 1, %s589_s11 }
  0x11   : > { %p387_p10 = pnand %p386_p9, %p657_p1  ;;  %p29_p12 = scmp.ge.s32.totalorder %s28_s29, 2 }
  0x12   : > { %p47_p13 = scmp.ne.s32.totalorder %s589_s11, %s585_s10  ;;  %p48_p0 = scmp.eq.s32.totalorder %s601_s14, 0 }
  0x13   : > { %389 = dma.hbm_to_vmem [thread:$0]  (!%p387_p10), %s133_s23, 1024, %s135_s26, [#allocation6], %s604_s27, %s604_s27, %s605_s28  }
  0x14   : > { %s804_s29 = smov (%p29_p12, %s28_s29), 0  ;;  %p699_p3 = por %p48_p0, %p47_p13 }
  0x15   : > { %p705_p5 = por %p661_p2, %p47_p13  ;;  %s35_s5 = ssub.s32 %s597_s13, %s804_s29 }
  0x16   : > { %p399_p7 = scmp.lt.s32.totalorder %s601_s14, 2  ;;  %p38_p9 = scmp.eq.s32.totalorder %s35_s5, 0 }
  0x17   : > { %s148_s6 = sand.u32 1, %s589_s11   ;;  %s376_s15 = sshll.u32 %s597_s13, 6 }
  0x18   : > { %s364_s7 = sshll.u32 %s148_s6, 6  ;;  %s159_s22 = scalar_lea.hbm %s788_s0, %s376_s15 }
  0x19   : > { %s714_s8 = scalar_select %p38_p9, %s589_s11, %s40_s30  }
  0x1a   : > { %s152_s23 = scalar_lea.vmem [#allocation2], %s364_s7  ;;  %s160_s18 = sshll.u32 %s159_s22, 4  ;;  %s161_s18 = int_to_ptr.hbm [resolvable:$true] %s160_s18 }
  0x1b   : > { %s162_s25 = sshll.u32 %s152_s23, 4  ;;  %p391_p2 = pnand %p399_p7, %p699_p3  ;;  %s163_s25 = int_to_ptr.vmem [resolvable:$true] %s162_s25 }
  0x1c   : > { %s149_s26 = scalar_lea.sflag [#allocation3], %s148_s6  ;;  %174 = sbr.rel (%p680_p8) target bundleno = 52 (0x34), region = 28 }
  0x1d   : > { %393 = dma.hbm_to_vmem [thread:$0]  (!%p391_p2), %s161_s18, 1024, %s163_s25, %s149_s26, %s604_s27, %s604_s27, %s605_s28  }
  0x1e   : > { %s728_s30 = sand.u32 (!%p680_p8), 1, %s585_s10  }
  0x1f   : > { %s368_s5 = sshll.u32 (!%p680_p8), %s728_s30, 6  ;;  %s177_s7 = scalar_lea.sflag (!%p680_p8), [#allocation3], %s728_s30 }
  0x20   : > { %s732_s15 = scalar_lea.vmem (!%p680_p8), [#allocation2], %s368_s5 }
  0x21   : > { %568 = dma.done.wait (%p667_p4), %s177_s7, 1024  }
  0x22   : > { %570 = vsyncadd (%p667_p4), %s177_s7, 4294966272 }
  0x23   : > { %572 = dma.done.wait (%p657_p1), [#allocation6], 1024  }
  0x24   : > { %574 = vsyncadd (%p657_p1), [#allocation6], 4294966272  ;;  %s377_s24 = sshll.u32 %s593_s12, 6  ;;  %v210_v0 = vld [vmem:[%s732_s15] sm:$0xff]  ;;  %v211_v2 = vld [vmem:[%s732_s15 + $0x8] sm:$0xff]  ;;  %s206_s12 = scalar_lea.vmem [#allocation7], %s368_s5 }
  0x25   : > { %v218_v1 = vld [vmem:[#allocation5] sm:$0xff]  ;;  %v219_v4 = vld [vmem:[#allocation5 + $0x8] sm:$0xff]  ;;  %v212_v5 = vld [vmem:[%s732_s15 + $0x10] sm:$0xff]  ;;  %s256_s27 = scalar_lea.hbm %s790_s2, %s377_s24  ;;  %s257_s28 = sshll.u32 %s206_s12, 4  ;;  %s258_s28 = int_to_ptr.vmem [resolvable:$true] %s257_s28 }
  0x26   : > { %v226_v3 = vadd.f32 %v218_v1, %v210_v0  ;;  %v220_v6 = vld [vmem:[#allocation5 + $0x10] sm:$0xff]  ;;  %v227_v7 = vadd.f32 %v219_v4, %v211_v2  ;;  %v213_v9 = vld [vmem:[%s732_s15 + $0x18] sm:$0xff]  ;;  %v214_v11 = vld [vmem:[%s732_s15 + $0x20] sm:$0xff]  ;;  %s259_s3 = sshll.u32 %s256_s27, 4  ;;  %s243_s6 = scalar_lea.sflag [#allocation4], %s728_s30  ;;  %s260_s3 = int_to_ptr.hbm [resolvable:$true] %s259_s3 }
  0x27   : > { %v228_v8 = vadd.f32 %v220_v6, %v212_v5  ;;  %v221_v10 = vld [vmem:[#allocation5 + $0x18] sm:$0xff]  ;;  %v222_v13 = vld [vmem:[#allocation5 + $0x20] sm:$0xff]  ;;  %v215_v14 = vld [vmem:[%s732_s15 + $0x28] sm:$0xff]  ;;  %s529_s16 = sshra.s32 %s260_s3, 4  ;;  %s535_s25 = scalar_lea.hbm %s790_s2, 128  ;;  %s530_s16 = int_to_ptr.hbm [resolvable:$true] %s529_s16 }
  0x28   : > { %234 = vst [vmem:[%s206_s12] sm:$0xff] %v226_v3  ;;  %v229_v12 = vadd.f32 %v221_v10, %v213_v9  ;;  %v223_v15 = vld [vmem:[#allocation5 + $0x28] sm:$0xff]  ;;  %v230_v16 = vadd.f32 %v222_v13, %v214_v11  ;;  %v216_v18 = vld [vmem:[%s732_s15 + $0x30] sm:$0xff]  ;;  %v217_v20 = vld [vmem:[%s732_s15 + $0x38] sm:$0xff]  ;;  %s531_s21 = scalar_lea.hbm %s530_s16, 64  ;;  %p536_p10 = scmp.lt.s32.totalorder %s530_s16, %s790_s2 }
  0x29   : > { %235 = vst [vmem:[%s206_s12 + $0x8] sm:$0xff] %v227_v7  ;;  %v231_v17 = vadd.f32 %v223_v15, %v215_v14  ;;  %v224_v19 = vld [vmem:[#allocation5 + $0x30] sm:$0xff]  ;;  %v225_v22 = vld [vmem:[#allocation5 + $0x38] sm:$0xff]  ;;  %p532_p1 = scmp.ne.s32.totalorder %s530_s16, %s531_s21  ;;  %p537_p12 = scmp.lt.s32.totalorder %s535_s25, %s531_s21 }
  0x2a   : > { %236 = vst [vmem:[%s206_s12 + $0x10] sm:$0xff] %v228_v8  ;;  %v232_v21 = vadd.f32 %v224_v19, %v216_v18  ;;  %v233_v23 = vadd.f32 %v225_v22, %v217_v20 }
  0x2b   : > { %237 = vst [vmem:[%s206_s12 + $0x18] sm:$0xff] %v229_v12  ;;  %p533_p4 = pnand %p532_p1, %p705_p5  ;;  %p538_p13 = por %p537_p12, %p536_p10 }
  0x2c   : > { %238 = vst [vmem:[%s206_s12 + $0x20] sm:$0xff] %v230_v16 }
  0x2d   : > { %239 = vst [vmem:[%s206_s12 + $0x28] sm:$0xff] %v231_v17  ;;  %p534_p8 = pneg %p533_p4 }
  0x2e   : > { %240 = vst [vmem:[%s206_s12 + $0x30] sm:$0xff] %v232_v21 }
  0x2f   : > { %241 = vst [vmem:[%s206_s12 + $0x38] sm:$0xff] %v233_v23  ;;  %p539_p0 = pnand %p538_p13, %p534_p8 }
  0x31   : > { %542 = shalt.err (!%p539_p0)
}
  0x32   : > { %s606_s30 = smov 128   ;;  %s607_s5 = smov 8  }
  0x33   : > { %384 = dma.vmem_to_hbm [thread:$0]  (%p705_p5), %s258_s28, 1024, %s260_s3, %s243_s6, %s606_s30, %s606_s30, %s607_s5  }
  0x34 PF: > { %s274_s7 = sand.u32 1, %s581_s9   ;;  %p395_p3 = pnand %p363_p11, %p672_p6 }
  0x35   : > { %s275_s15 = scalar_lea.sflag [#allocation4], %s274_s7 }
  0x36   : > { %p396_p7 = pneg %p395_p3 }
  0x38   : > { %576 = dma.done.wait (%p396_p7), %s275_s15, 1024  }
  0x39   : > { %578 = vsyncadd (%p396_p7), %s275_s15, 4294966272  ;;  %s19_s14 = sadd.s32 1, %s601_s14   ;;  %s798_s9 = smov %s585_s10 }
  0x3a   : > { %p16_p9 = scmp.ge.s32.totalorder %s19_s14, 4   ;;  %s799_s10 = smov %s589_s11 }
  0x3b   : > { %s800_s11 = smov %s714_s8  ;;  %s801_s12 = smov %s597_s13 }
  0x3c   : > { %s802_s13 = smov %s804_s29  ;;  %18 = sbr.rel (!%p16_p9) target bundleno = 7 (0x7), region = 78 }
  0x41   :  { %281 = vsyncpa [#allocation3], 1 }
  0x42   :  { %283 = vsyncpa [#allocation3 + $0x1], 1 }
  0x43   :  { %284 = vsyncpa [#allocation6], 1 }
  0x44   :  { %285 = vsyncpa [#allocation4], 1 }
  0x45   :  { %287 = vsyncpa [#allocation4 + $0x1], 1 }

</bundles_post_ra>
